<compile_context>
chip_gen: v6e
topology: v6e:2x2x1
jax: 0.10.0
libtpu: 0.0.40
codegen_flags: <defaults>
</compile_context>

<pallas_src>
import functools
import math

import jax
import jax.numpy as jnp
from jax.experimental import pallas as pl
from jax.experimental.pallas import tpu as pltpu

_LANE = 128


# ----------------------------- glue (plain JAX) ------------------------------

def shift_dim(x, src_dim, dest_dim):
    """JAX equivalent of videogpt's shift_dim: remove src axis, insert at dest."""
    n = x.ndim
    return jnp.moveaxis(x, src_dim % n, dest_dim % n)


# ------------------------------ sizing helpers --------------------------------

def _round_up(x, m):
    return -(-x // m) * m


def _sublane_pack(itemsize):
    # 32-bit -> 8 sublanes per vreg tile, bf16 -> 16, int8/fp8 -> 32.
    return 8 * max(1, 4 // itemsize)


def _vmem_caps():
    """(physical VMEM per core, scoped vmem_limit_bytes to request)."""
    try:
        cap = int(pltpu.get_tpu_info().vmem_capacity_bytes)
    except Exception:
        cap = 64 * 1024 * 1024  # conservative default: v7x has 64 MiB per TC
    # Scoped limit with headroom for Mosaic internal scratch:
    #   v7x (64 MiB)      -> 40 MiB
    #   v5e/v6e (128 MiB) -> 80 MiB   (v5e's default scoped limit is only 16 MiB)
    return cap, min(int(cap * 0.625), 96 * 1024 * 1024)


def _per_batch_vmem_bytes(L, D, itemsize, c_itemsize, lane_dense):
    """Layout-aware VMEM bytes per batch row: lane dim rounded up to 128,
    sublane dim rounded up to the dtype packing, ~30% relayout headroom."""
    sub_io = _sublane_pack(itemsize)
    sub_c = _sublane_pack(c_itemsize)
    if lane_dense:
        io_row = _round_up(L * D, _LANE) * itemsize               # (bt, L*D) slab row
    else:
        io_row = _round_up(L, sub_io) * _round_up(D, _LANE) * itemsize
    dma = 4 * 2 * io_row                                          # q,k,v,o double-buffered
    ops = 3 * _round_up(L, sub_c) * _round_up(D, _LANE) * c_itemsize   # bf16 q,k,v views
    scores = (2 * _round_up(L, 8) * _round_up(L, _LANE) * 4            # f32 s, exp(s)
              + _round_up(L, sub_c) * _round_up(L, _LANE) * c_itemsize)  # bf16 probs
    acc = 2 * _round_up(L, 8) * _round_up(D, _LANE) * 4                # f32 out + relayout
    return int((dma + ops + scores + acc) * 1.3)


def _choose_block_batch(B, per_b_vmem, budget_bytes, sub_align):
    """Batch tile: as large as the layout-aware VMEM budget allows, but small
    enough that the grid has ~8+ steps (pipeline overlap; >= 4 per v7x TC)."""
    bt_vmem = max(sub_align, (budget_bytes // per_b_vmem) // sub_align * sub_align)
    bt_depth = _round_up(max(1, -(-B // 8)), sub_align)   # keeps >= ~8 grid steps
    bt = max(sub_align, min(bt_vmem, bt_depth, _round_up(B, sub_align)))
    # Among nearby aligned tile sizes pick the one minimizing batch-padding
    # waste; prefer an even number of grid steps (v7x core balance), then the
    # larger tile.
    best_key, best_bt = None, bt
    lo = max(sub_align, (bt // 2) // sub_align * sub_align)
    for cand in range(lo, bt + 1, sub_align):
        steps = -(-B // cand)
        key = (steps * cand - B, steps % 2, -cand)
        if best_key is None or key < best_key:
            best_key, best_bt = key, cand
    return int(best_bt)


# ------------------------------ Pallas kernel --------------------------------

def _attn_kernel(q_ref, k_ref, v_ref, o_ref, *, scale, seq_len, head_dim,
                 lane_dense, compute_dtype):
    bt = q_ref.shape[0]
    q = q_ref[...]
    k = k_ref[...]
    v = v_ref[...]
    if lane_dense:
        # Inputs arrive as lane-dense (bt, L*D) slabs; relayout to (bt, L, D)
        # in-kernel (XLU work that co-issues with the MXU/EUP streams).
        q = q.reshape(bt, seq_len, head_dim)
        k = k.reshape(bt, seq_len, head_dim)
        v = v.reshape(bt, seq_len, head_dim)

    # Fold 1/sqrt(D) into q (O(L*D) instead of O(L*L) scaling), then feed the
    # MXU bf16 operands with f32 accumulation (bf16 is the native MXU rate on
    # v6e/v7x; also faster on v5e).
    qs = (q * jnp.asarray(scale, dtype=q.dtype)).astype(compute_dtype)
    s = jnp.einsum("bqd,bkd->bqk", qs, k.astype(compute_dtype),
                   preferred_element_type=jnp.float32)

    # Numerically-stable softmax; normalization deferred to the (bt, L, D)
    # output. Exact reciprocal: it only touches bt*L elements, so approx would
    # buy nothing while costing accuracy.
    s = s - jnp.max(s, axis=-1, keepdims=True)
    p = jnp.exp(s)
    inv_l = 1.0 / jnp.sum(p, axis=-1, keepdims=True)

    o = jnp.einsum("bqk,bkd->bqd", p.astype(compute_dtype),
                   v.astype(compute_dtype), preferred_element_type=jnp.float32)
    o = (o * inv_l).astype(o_ref.dtype)

    if lane_dense:
        # D < 128: lane-dense (bt, L*D) slab -> full-width unmasked stores.
        o_ref[...] = o.reshape(bt, seq_len * head_dim)
    else:
        o_ref[...] = o


def pallas_scaled_dot_product_attention(q, k, v):
    """q, k, v: (B, L, D). Full attention over L, batched over B via the grid."""
    B, L, D = q.shape
    dtype = q.dtype
    itemsize = jnp.dtype(dtype).itemsize
    scale = 1.0 / math.sqrt(D)

    # bf16 MXU operands (f32 accumulation) when inputs are f32/bf16.
    if dtype == jnp.float32 or dtype == jnp.bfloat16:
        compute_dtype = jnp.bfloat16
    else:
        compute_dtype = dtype
    c_itemsize = jnp.dtype(compute_dtype).itemsize

    lane_dense = (D % _LANE) != 0

    cap, vmem_limit = _vmem_caps()
    per_b = _per_batch_vmem_bytes(L, D, itemsize, c_itemsize, lane_dense)
    bt = _choose_block_batch(B, per_b, budget_bytes=int(vmem_limit * 0.85),
                             sub_align=_sublane_pack(itemsize))
    # Very long axial dims: even an 8-row tile could overshoot the derived
    # limit; raise the scoped limit toward physical VMEM rather than failing.
    # TODO(synk): add a K/V-tiled online-softmax inner loop for axial L in the
    # thousands so the (bt, L, L) score buffer stops being the VMEM limiter.
    vmem_limit = int(min(int(cap * 0.95), max(vmem_limit, per_b * bt / 0.85)))

    # Pad the flattened batch so bt divides it (padded rows are zeros; their
    # outputs are computed and discarded).
    B_pad = _round_up(B, bt)
    if B_pad != B:
        pad = ((0, B_pad - B), (0, 0), (0, 0))
        q = jnp.pad(q, pad)
        k = jnp.pad(k, pad)
        v = jnp.pad(v, pad)

    if lane_dense:
        # D < 128: present q/k/v (and o) to the kernel as lane-dense (B, L*D)
        # slabs so VMEM blocks are not lane-padded to 128 per D-row and the
        # HBM->VMEM DMAs move long contiguous rows.
        q = q.reshape(B_pad, L * D)
        k = k.reshape(B_pad, L * D)
        v = v.reshape(B_pad, L * D)
        spec = pl.BlockSpec((bt, L * D), lambda i: (i, 0))
        out_shape = jax.ShapeDtypeStruct((B_pad, L * D), dtype)
    else:
        spec = pl.BlockSpec((bt, L, D), lambda i: (i, 0, 0))
        out_shape = jax.ShapeDtypeStruct((B_pad, L, D), dtype)

    kernel = functools.partial(_attn_kernel, scale=scale, seq_len=L, head_dim=D,
                               lane_dense=lane_dense, compute_dtype=compute_dtype)

    out = pl.pallas_call(
        kernel,
        out_shape=out_shape,
        grid=(B_pad // bt,),
        in_specs=[spec, spec, spec],
        out_specs=spec,
        compiler_params=pltpu.CompilerParams(
            dimension_semantics=("parallel",),
            vmem_limit_bytes=vmem_limit,
        ),
        cost_estimate=pl.CostEstimate(
            flops=4 * B_pad * L * L * D,            # QK^T + PV matmuls
            transcendentals=B_pad * L * L,          # exp
            bytes_accessed=4 * B_pad * L * D * itemsize,
        ),
    )(q, k, v)

    if lane_dense:
        out = out.reshape(B_pad, L, D)
    return out[:B]


# --------------------------- AxialAttention forward --------------------------

def axial_attention_forward(q, k, v, n_dim, axial_dim):
    """Reproduces AxialAttention(n_dim, axial_dim).forward(q, k, v, None, None)."""
    if axial_dim < 0:
        ad = 2 + n_dim + 1 + axial_dim
    else:
        ad = axial_dim + 2

    qs = shift_dim(q, ad, -2)
    ks = shift_dim(k, ad, -2)
    vs = shift_dim(v, ad, -2)
    old_shape = vs.shape

    qs = qs.reshape(-1, qs.shape[-2], qs.shape[-1])
    ks = ks.reshape(-1, ks.shape[-2], ks.shape[-1])
    vs = vs.reshape(-1, vs.shape[-2], vs.shape[-1])

    out = pallas_scaled_dot_product_attention(qs, ks, vs)

    out = out.reshape(old_shape)
    out = shift_dim(out, -2, ad)
    return out


# -------------------------------- reference ----------------------------------

def _reference_forward(q, k, v, n_dim, axial_dim):
    if axial_dim < 0:
        ad = 2 + n_dim + 1 + axial_dim
    else:
        ad = axial_dim + 2
    qs = shift_dim(q, ad, -2)
    ks = shift_dim(k, ad, -2)
    vs = shift_dim(v, ad, -2)
    old_shape = vs.shape
    qs = qs.reshape(-1, qs.shape[-2], qs.shape[-1])
    ks = ks.reshape(-1, ks.shape[-2], ks.shape[-1])
    vs = vs.reshape(-1, vs.shape[-2], vs.shape[-1])
    attn = jnp.einsum("bqd,bkd->bqk", qs, ks) / math.sqrt(qs.shape[-1])
    attn = jax.nn.softmax(attn, axis=-1)
    out = jnp.einsum("bqk,bkd->bqd", attn, vs)
    return shift_dim(out.reshape(old_shape), -2, ad)


# ----------------------------------- main -------------------------------------

if __name__ == "__main__":
    # Small shapes implied by the forward: (b, n_head, T, H, W, c), n_dim=3.
    b, n_head, T, H, W, c = 2, 2, 8, 4, 4, 32
    n_dim = 3
    axial_dim = 0  # attend over the temporal (T) axis

    key = jax.random.PRNGKey(0)
    kq, kk, kv = jax.random.split(key, 3)
    q = jax.random.normal(kq, (b, n_head, T, H, W, c), dtype=jnp.float32)
    k = jax.random.normal(kk, (b, n_head, T, H, W, c), dtype=jnp.float32)
    v = jax.random.normal(kv, (b, n_head, T, H, W, c), dtype=jnp.float32)

    out = axial_attention_forward(q, k, v, n_dim, axial_dim)
    out = jax.block_until_ready(out)

    ref = _reference_forward(q, k, v, n_dim, axial_dim)
    assert out.shape == q.shape, (out.shape, q.shape)
    # Tolerance sized for bf16 MXU operands (f32 accumulation) vs. the pure-f32
    # reference; the softmax normalization itself uses an exact reciprocal.
    assert jnp.allclose(out, ref, atol=3e-2, rtol=3e-2), "mismatch vs reference"

    print("KERNEL_OK")
</pallas_src>

<mosaic_0001>
module attributes {stable_mosaic.version = 11 : i64} {
  func.func @_attn_kernel(%arg0: i32, %arg1: memref<8x256xf32, #tpu.memory_space<vmem>>, %arg2: memref<8x256xf32, #tpu.memory_space<vmem>>, %arg3: memref<8x256xf32, #tpu.memory_space<vmem>>, %arg4: memref<8x256xf32, #tpu.memory_space<vmem>>) attributes {dimension_semantics = [#tpu.dimension_semantics<parallel>], iteration_bounds = array<i64: 8>, scalar_prefetch = 0 : i64, scratch_operands = 0 : i64, tpu.core_type = #tpu.core_type<tc>, window_params = [{transform_indices = @transform_0, window_bounds = array<i64: 8, 256>}, {transform_indices = @transform_1, window_bounds = array<i64: 8, 256>}, {transform_indices = @transform_2, window_bounds = array<i64: 8, 256>}, {transform_indices = @transform_3, window_bounds = array<i64: 8, 256>}]} {
    %c0 = arith.constant 0 : index
    %c0_0 = arith.constant 0 : index
    %0 = vector.load %arg1[%c0, %c0_0] : memref<8x256xf32, #tpu.memory_space<vmem>>, vector<8x256xf32>
    %c0_1 = arith.constant 0 : index
    %c0_2 = arith.constant 0 : index
    %1 = vector.load %arg2[%c0_1, %c0_2] : memref<8x256xf32, #tpu.memory_space<vmem>>, vector<8x256xf32>
    %c0_3 = arith.constant 0 : index
    %c0_4 = arith.constant 0 : index
    %2 = vector.load %arg3[%c0_3, %c0_4] : memref<8x256xf32, #tpu.memory_space<vmem>>, vector<8x256xf32>
    %3 = vector.shape_cast %0 : vector<8x256xf32> to vector<8x8x32xf32>
    %4 = vector.shape_cast %1 : vector<8x256xf32> to vector<8x8x32xf32>
    %5 = vector.shape_cast %2 : vector<8x256xf32> to vector<8x8x32xf32>
    %cst = arith.constant 0.176776692 : f32
    %6 = vector.broadcast %cst : f32 to vector<8x8x32xf32>
    %7 = arith.mulf %3, %6 : vector<8x8x32xf32>
    %8 = arith.truncf %7 : vector<8x8x32xf32> to vector<8x8x32xbf16>
    %9 = arith.truncf %4 : vector<8x8x32xf32> to vector<8x8x32xbf16>
    "tpu.trace_start"() <{level = 10 : i32, message = "bqd,bkd->bqk"}> : () -> ()
    %cst_5 = arith.constant dense<0.000000e+00> : vector<8x8x8xf32>
    %10 = tpu.matmul %8, %9, %cst_5 {dimension_numbers = #tpu.dot_dimension_numbers<[2], [2], [1], [1], [0, 0, 0, 1, 1, 1], [0], [0]>} : vector<8x8x32xbf16>, vector<8x8x32xbf16>, vector<8x8x8xf32> -> vector<8x8x8xf32>
    "tpu.trace_stop"() : () -> ()
    %cst_6 = arith.constant dense<0xFF800000> : vector<8x8xf32>
    %11 = vector.multi_reduction <maximumf>, %10, %cst_6 [2] : vector<8x8x8xf32> to vector<8x8xf32>
    %12 = vector.shape_cast %11 : vector<8x8xf32> to vector<8x8x1xf32>
    %13 = vector.broadcast %12 : vector<8x8x1xf32> to vector<8x8x8xf32>
    %14 = arith.subf %10, %13 : vector<8x8x8xf32>
    %15 = math.exp %14 : vector<8x8x8xf32>
    %cst_7 = arith.constant dense<0.000000e+00> : vector<8x8xf32>
    %16 = vector.multi_reduction <add>, %15, %cst_7 [2] : vector<8x8x8xf32> to vector<8x8xf32>
    %17 = vector.shape_cast %16 : vector<8x8xf32> to vector<8x8x1xf32>
    %cst_8 = arith.constant 1.000000e+00 : f32
    %18 = vector.broadcast %cst_8 : f32 to vector<8x8x1xf32>
    %19 = arith.divf %18, %17 : vector<8x8x1xf32>
    %20 = arith.truncf %15 : vector<8x8x8xf32> to vector<8x8x8xbf16>
    %21 = arith.truncf %5 : vector<8x8x32xf32> to vector<8x8x32xbf16>
    "tpu.trace_start"() <{level = 10 : i32, message = "bqk,bkd->bqd"}> : () -> ()
    %cst_9 = arith.constant dense<0.000000e+00> : vector<8x8x32xf32>
    %22 = tpu.matmul %20, %21, %cst_9 {dimension_numbers = #tpu.dot_dimension_numbers<[2], [1], [1], [2], [0, 0, 0, 1, 1, 2], [0], [0]>} : vector<8x8x8xbf16>, vector<8x8x32xbf16>, vector<8x8x32xf32> -> vector<8x8x32xf32>
    "tpu.trace_stop"() : () -> ()
    %23 = vector.broadcast %19 : vector<8x8x1xf32> to vector<8x8x32xf32>
    %24 = arith.mulf %22, %23 : vector<8x8x32xf32>
    %25 = vector.shape_cast %24 : vector<8x8x32xf32> to vector<8x256xf32>
    %c0_10 = arith.constant 0 : index
    %c0_11 = arith.constant 0 : index
    %26 = vector.load %arg4[%c0_10, %c0_11] : memref<8x256xf32, #tpu.memory_space<vmem>>, vector<8x256xf32>
    tpu.vector_store %arg4[%c0_10, %c0_11], %25 {strides = array<i32>} : memref<8x256xf32, #tpu.memory_space<vmem>>, vector<8x256xf32>,
    return
  }
  func.func @transform_0(%arg0: i32) -> (i32, i32) {
    %c0_i32 = arith.constant 0 : i32
    %c0_i32_0 = arith.constant 0 : i32
    return %arg0, %c0_i32 : i32, i32
  }
  func.func @transform_1(%arg0: i32) -> (i32, i32) {
    %c0_i32 = arith.constant 0 : i32
    %c0_i32_0 = arith.constant 0 : i32
    return %arg0, %c0_i32 : i32, i32
  }
  func.func @transform_2(%arg0: i32) -> (i32, i32) {
    %c0_i32 = arith.constant 0 : i32
    %c0_i32_0 = arith.constant 0 : i32
    return %arg0, %c0_i32 : i32, i32
  }
  func.func @transform_3(%arg0: i32) -> (i32, i32) {
    %c0_i32 = arith.constant 0 : i32
    %c0_i32_0 = arith.constant 0 : i32
    return %arg0, %c0_i32 : i32, i32
  }
}

</mosaic_0001>

<bundles_post_ra>
// kernel: tpu_custom_call.1
= control target key start
LH: loop header
LB: loop body
LE: loop exit
PB: predicated region body
PF: predicated region fallthrough
CT: control target
= control target key end

     0   :  { %s2851_s0 = inlined_call_operand.hbm [shape: f32[64,256], index: 0, kind: input, shape index: {}]   ;;  %s2852_s1 = inlined_call_operand.hbm [shape: f32[64,256], index: 1, kind: input, shape index: {}]   ;;  %s2853_s2 = inlined_call_operand.hbm [shape: f32[64,256], index: 2, kind: input, shape index: {}]   ;;  %s2854_s3 = inlined_call_operand.hbm [shape: f32[64,256], index: 3, kind: output, shape index: {}]  }
   0x1   :  { %2858 = sst [smem:[#allocation13_spill]] %s2851_s0 }
   0x2   :  { %2859 = sst [smem:[#allocation14_spill]] %s2852_s1 }
   0x3   :  { %8 = vsyncpa [#allocation3], 0 }
   0x4   :  { %10 = vsyncpa [#allocation3 + $0x1], 0 }
   0x5   :  { %11 = vsyncpa [#allocation6], 0 }
   0x6   :  { %13 = vsyncpa [#allocation6 + $0x1], 0 }
   0x7   :  { %14 = vsyncpa [#allocation4], 0 }
   0x8   :  { %16 = vsyncpa [#allocation4 + $0x1], 0  ;;  %s2358_s12 = smov 0   ;;  %s2360_s13 = smov 0  }
   0x9   :  { %s2362_s14 = smov 0   ;;  %s2364_s15 = smov 0  }
   0xa LB: > { %s2379_s16 = sadd.s32 4294967295, %s2325_s15   ;;  %s1908_s17 = sadd.s32 4294967294, %s2325_s15   ;;  %s2325_s15 = sphi %s2364_s15, %s2879_s15   ;;  %s2321_s14 = sphi %s2362_s14, %s2878_s14   ;;  %s2317_s13 = sphi %s2360_s13, %s2877_s13   ;;  %s2313_s12 = sphi %s2358_s12, %s2876_s12  }
   0xb   : > { %s2383_s18 = sadd.s32 1, %s2325_s15   ;;  %s29_s19 = sadd.s32 1, %s2321_s14 }
   0xc   : > { %s26_s20 = ssub.s32 %s2325_s15, %s2383_s18  ;;  %p36_p0 = scmp.ne.s32.totalorder %s2321_s14, %s2317_s13 }
   0xd   : > { %p27_p1 = scmp.eq.s32.totalorder %s26_s20, 0  ;;  %p37_p2 = scmp.eq.s32.totalorder %s2325_s15, 0 }
   0xe   : > { %p42_p3 = scmp.ne.s32.totalorder %s2317_s13, %s2313_s12  ;;  %p43_p4 = scmp.eq.s32.totalorder %s2379_s16, 0 }
   0xf   : > { %s2395_s21 = scalar_select %p27_p1, %s2321_s14, %s29_s19  }
  0x10   : > { %p38_p5 = por %p37_p2, %p36_p0  ;;  %p2397_p6 = por %p43_p4, %p42_p3 }
  0x11   : > { %2860 = sst [smem:[#allocation12_spill]] %s2395_s21  ;;  %p118_p7 = scmp.eq.s32.totalorder %s2379_s16, 7 }
  0x12   : > { %s2861_s22 = scalar_select %p2397_p6, 1, 0 }
  0x13   : > { %p124_p8 = scmp.eq.s32.totalorder %s1908_s17, 7  ;;  %p2100_p9 = scmp.lt.s32.totalorder %s2325_s15, 8 }
  0x14   : > { %p2403_p10 = por %p118_p7, %p36_p0  ;;  %s2855_s25 = sand.u32 1, %s2321_s14  }
  0x15   : > { %p2407_p11 = por %p124_p8, %p42_p3  ;;  %s2413_s26 = sshll.u32 %s2325_s15, 8 }
  0x16   : > { %s2862_s23 = scalar_select %p2403_p10, 1, 0 }
  0x17   : > { %s2863_s24 = scalar_select %p2407_p11, 1, 0 }
  0x18   : > { %s2417_s27 = sshll.u32 %s2855_s25, 4  ;;  %p2419_p12 = pnand %p2100_p9, %p38_p5 }
  0x19   : > { %s163_s29 = sand.u32 1, %s2325_s15   ;;  %s2865_s1 = sld [smem:[#allocation14_spill]] }
  0x1a   : > { %s167_s6 = scalar_lea.vmem [#allocation5], %s2417_s27  ;;  %s2432_s8 = scalar_lea.sflag [#allocation6], %s163_s29 }
  0x1b   : > { %s175_s7 = sshll.u32 %s167_s6, 4  ;;  %p2438_p1 = pneg %p2419_p12  ;;  %s176_s7 = int_to_ptr.vmem [resolvable:$true] %s175_s7 }
  0x1f   : > { %s2428_s5 = scalar_lea.hbm %s2865_s1, %s2413_s26  ;;  %s2178_s19 = scalar_lea.hbm %s2865_s1, 2048 }
  0x20   : > { %s2173_s9 = scalar_lea.hbm %s2428_s5, 256  ;;  %p2179_p4 = scmp.lt.s32.totalorder %s2428_s5, %s2865_s1 }
  0x21   : > { %p2174_p0 = scmp.ne.s32.totalorder %s2428_s5, %s2173_s9  ;;  %p2180_p5 = scmp.lt.s32.totalorder %s2178_s19, %s2173_s9 }
  0x23   : > { %p2176_p2 = pnand %p2438_p1, %p2174_p0  ;;  %p2181_p7 = por %p2180_p5, %p2179_p4 }
  0x25   : > { %p2177_p3 = pneg %p2176_p2 }
  0x27   : > { %p2182_p8 = pnand %p2181_p7, %p2177_p3 }
  0x29   : > { %2185 = shalt.err (!%p2182_p8)
}
  0x2a   : > { %s2186_s29 = scalar_lea.vmem %s176_s7, 256  ;;  %s2327_s4 = smov [#allocation5]  }
  0x2b   : > { %p2187_p9 = scmp.ne.s32.totalorder %s176_s7, %s2186_s29  ;;  %s2191_s6 = sshll.u32 %s2327_s4, 4  ;;  %s2192_s6 = int_to_ptr.vmem [resolvable:$false] %s2191_s6 }
  0x2c   : > { %s2193_s25 = scalar_lea.vmem %s2192_s6, 512  ;;  %p2194_p0 = scmp.lt.s32.totalorder %s176_s7, %s2192_s6 }
  0x2d   : > { %p2189_p13 = pnand %p2187_p9, %p2438_p1  ;;  %p2195_p2 = scmp.lt.s32.totalorder %s2193_s25, %s2186_s29 }
  0x2f   : > { %p2190_p11 = pneg %p2189_p13  ;;  %p2196_p10 = por %p2195_p2, %p2194_p0 }
  0x31   : > { %p2197_p6 = pnand %p2196_p10, %p2190_p11 }
  0x33   : > { %2200 = shalt.err (!%p2197_p6)
}
  0x34   : > { %2092 = dma.hbm_to_vmem [thread:$0]  (!%p2419_p12), %s2428_s5, 256, %s176_s7, %s2432_s8  }
  0x35   : > { %p199_p13 = scmp.lt.s32.totalorder %s2325_s15, 9  ;;  %s2867_s0 = sld [smem:[#allocation13_spill]] }
  0x36   : > { %p2868_p3 = scmp.ge.s32.totalorder %s2325_s15, 1  ;;  %s148_s19 = scalar_lea.vmem [#allocation2], %s2417_s27 }
  0x37   : > { %s156_s20 = sshll.u32 %s148_s19, 4  ;;  %s2870_s30 = sand.u32 1, %s2321_s14   ;;  %s157_s20 = int_to_ptr.vmem [resolvable:$true] %s156_s20 }
  0x38   : > { %p2466_p6 = pnand %p2868_p3, %p199_p13  ;;  %s145_s29 = scalar_lea.sflag [#allocation3], %s2870_s30 }
  0x3a   : > { %s2869_s25 = scalar_select %p2466_p6, 1, 0 }
  0x3b   : > { %s2462_s17 = scalar_lea.hbm %s2867_s0, %s2413_s26  ;;  %s2206_s6 = scalar_lea.hbm %s2867_s0, 2048 }
  0x3c   : > { %s2201_s5 = scalar_lea.hbm %s2462_s17, 256  ;;  %p2207_p5 = scmp.lt.s32.totalorder %s2462_s17, %s2867_s0 }
  0x3d   : > { %p2202_p10 = scmp.ne.s32.totalorder %s2462_s17, %s2201_s5  ;;  %p2208_p7 = scmp.lt.s32.totalorder %s2206_s6, %s2201_s5 }
  0x3f   : > { %p2204_p11 = pnand %p2202_p10, %p2438_p1  ;;  %p2209_p8 = por %p2208_p7, %p2207_p5 }
  0x41   : > { %p2205_p4 = pneg %p2204_p11 }
  0x43   : > { %p2210_p9 = pnand %p2209_p8, %p2205_p4 }
  0x45   : > { %2213 = shalt.err (!%p2210_p9)
}
  0x46   : > { %s2214_s19 = scalar_lea.vmem %s157_s20, 256  ;;  %s2328_s30 = smov [#allocation2]  }
  0x47   : > { %p2215_p0 = scmp.ne.s32.totalorder %s157_s20, %s2214_s19  ;;  %s2219_s1 = sshll.u32 %s2328_s30, 4  ;;  %s2220_s1 = int_to_ptr.vmem [resolvable:$false] %s2219_s1 }
  0x48   : > { %s2221_s21 = scalar_lea.vmem %s2220_s1, 512  ;;  %p2222_p3 = scmp.lt.s32.totalorder %s157_s20, %s2220_s1 }
  0x49   : > { %p2217_p2 = pnand %p2215_p0, %p2438_p1  ;;  %p2223_p10 = scmp.lt.s32.totalorder %s2221_s21, %s2214_s19 }
  0x4b   : > { %p2218_p13 = pneg %p2217_p2  ;;  %p2224_p11 = por %p2223_p10, %p2222_p3 }
  0x4d   : > { %p2225_p6 = pnand %p2224_p11, %p2218_p13 }
  0x4f   : > { %2228 = shalt.err (!%p2225_p6)
}
  0x50   : > { %2089 = dma.hbm_to_vmem [thread:$0]  (!%p2419_p12), %s2462_s17, 256, %s157_s20, %s145_s29  }
  0x51   : > { %s192_s4 = scalar_lea.hbm %s2853_s2, %s2413_s26  ;;  %s186_s6 = scalar_lea.vmem [#allocation7], %s2417_s27 }
  0x52   : > { %s194_s9 = sshll.u32 %s186_s6, 4  ;;  %s2229_s11 = scalar_lea.hbm %s192_s4, 256  ;;  %s195_s9 = int_to_ptr.vmem [resolvable:$true] %s194_s9 }
  0x53   : > { %p2230_p4 = scmp.ne.s32.totalorder %s192_s4, %s2229_s11  ;;  %s2234_s19 = scalar_lea.hbm %s2853_s2, 2048 }
  0x54   : > { %p2235_p6 = scmp.lt.s32.totalorder %s192_s4, %s2853_s2  ;;  %p2236_p8 = scmp.lt.s32.totalorder %s2234_s19, %s2229_s11 }
  0x55   : > { %p2232_p5 = pnand %p2230_p4, %p2438_p1 }
  0x56   : > { %p2237_p9 = por %p2236_p8, %p2235_p6 }
  0x57   : > { %p2233_p7 = pneg %p2232_p5 }
  0x59   : > { %p2238_p0 = pnand %p2237_p9, %p2233_p7 }
  0x5b   : > { %2241 = shalt.err (!%p2238_p0)
}
  0x5c   : > { %s2242_s26 = scalar_lea.vmem %s195_s9, 256  ;;  %s2329_s27 = smov [#allocation7]  }
  0x5d   : > { %p2243_p2 = scmp.ne.s32.totalorder %s195_s9, %s2242_s26  ;;  %s2247_s17 = sshll.u32 %s2329_s27, 4  ;;  %s2248_s17 = int_to_ptr.vmem [resolvable:$false] %s2247_s17 }
  0x5e   : > { %s2249_s20 = scalar_lea.vmem %s2248_s17, 512  ;;  %p2250_p10 = scmp.lt.s32.totalorder %s195_s9, %s2248_s17 }
  0x5f   : > { %p2245_p13 = pnand %p2243_p2, %p2438_p1  ;;  %p2251_p11 = scmp.lt.s32.totalorder %s2249_s20, %s2242_s26 }
  0x61   : > { %p2246_p3 = pneg %p2245_p13  ;;  %p2252_p4 = por %p2251_p11, %p2250_p10 }
  0x63   : > { %p2253_p5 = pnand %p2252_p4, %p2246_p3 }
  0x65   : > { %2256 = shalt.err (!%p2253_p5)
}
  0x66   : > { %2095 = dma.hbm_to_vmem [thread:$0]  (!%p2419_p12), %s192_s4, 256, %s195_s9, %s2432_s8  }
  0x67   : > { %p2871_p7 = scmp.ne.s32.totalorder %s2869_s25, 0 }
  0x68   : > { %s2510_s0 = sand.u32 (!%p2871_p7), 1, %s2317_s13   ;;  %p2872_p1 = scmp.ne.s32.totalorder (!%p2871_p7), %s2861_s22, 0 }
  0x69   : > { %203 = sbr.rel (%p2871_p7) target bundleno = 1035 (0x40b), region = 32  ;;  %s2513_s10 = sshll.u32 (!%p2871_p7), %s2510_s0, 4 }
  0x6a   : > { %s206_s29 = scalar_lea.sflag (!%p2871_p7), [#allocation3], %s2510_s0  ;;  %s209_s5 = scalar_lea.vmem (!%p2871_p7), [#allocation2], %s2513_s10 }
  0x6e   : > { %2300 = dma.done.wait (%p2872_p1), %s206_s29, 256  }
  0x6f   : > { %2302 = vsyncadd (%p2872_p1), %s206_s29, 4294967040  ;;  %s214_s28 = sand.u32 1, %s2379_s16   ;;  %s218_s25 = scalar_lea.vmem [#allocation5], %s2513_s10 }
  0x70   : > { %s215_s8 = scalar_lea.sflag [#allocation6], %s214_s28 }
  0x71   : > { %2304 = dma.done.wait (%p2872_p1), %s215_s8, 512  }
  0x72   : > { %2306 = vsyncadd (%p2872_p1), %s215_s8, 4294966784  ;;  %v2527_v0 = vld [vmem:[%s218_s25] sm:$0xff]  ;;  %s2330_s7 = smov 32   ;;  %s2331_s4 = smov 96   ;;  %v2533_v1 = vld [vmem:[%s218_s25 + $0x8] sm:$0xff]  ;;  %v2333_v3 = vmov 0.0   ;;  %v292_v9 = vlaneseq }
  0x73   : > { %430 = vrot.lane.b32.xlu1 %v2527_v0, %s2330_s7  ;;  %424 = vrot.lane.b32.xlu0 %v2527_v0, %s2331_s4  ;;  %s2332_s6 = smov 64   ;;  %v2543_v2 = vld [vmem:[%s209_s5] sm:$0xff]  ;;  %v2551_v4 = vld [vmem:[%s209_s5 + $0x8] sm:$0xff]  ;;  %vm2334_vm0 = vmmov 0   ;;  %s227_s22 = scalar_lea.vmem [#allocation7], %s2513_s10  ;;  %vm759_vm1 = vcmask 261120  }
  0x74   : > { %1982 = vmatprep.subr.bf16.mxu0 %v2333_v3  ;;  %1988 = vmatprep.subr.bf16.mxu1 %v2333_v3  ;;  %v2566_v5 = vld [vmem:[%s227_s22] sm:$0xff]  ;;  %v2574_v6 = vld [vmem:[%s227_s22 + $0x8] sm:$0xff]  ;;  %v2335_v7 = vmov 1983009808   ;;  %v293_v13 = vshrl.u32 %v292_v9, 7  ;;  %vm1128_vm2 = vcmask 64512  }
  0x75   : > { %1984 = vmatprep.mubr.msk.bf16.mxu0 %vm2334_vm0, %v2333_v3  ;;  %1990 = vmatprep.mubr.msk.bf16.mxu1 %vm2334_vm0, %v2333_v3  ;;  %v290_v8 = vunpack.c.l.s4 %v2335_v7  ;;  %v2336_v15 = vmov 1934713408   ;;  %vm1236_vm3 = vcmask 1043456   ;;  %vm1771_vm4 = vcmask 523264   ;;  %s259_s9 = scalar_lea.vmem [#allocation8], %s2513_s10  ;;  %s1949_s11 = sshll.u32 %s2379_s16, 8 }
  0x76   : > { %v354_v16 = vunpack.c.l.s4 %v2336_v15  ;;  %vm1773_vm5 = vcmask 785408   ;;  %s1795_s1 = sshll.u32 %s259_s9, 4  ;;  %s2814_s30 = scalar_lea.hbm %s2854_s3, %s1949_s11  ;;  %s1796_s1 = int_to_ptr.vmem [resolvable:$true] %s1795_s1 }
  0x77   : > { %434 = vrot.lane.b32.xlu1 %v2533_v1, %s2331_s4  ;;  %427 = vrot.lane.b32.xlu0 %v2527_v0, %s2332_s6  ;;  %v291_v12 = vunpack.c.0.s8 %v290_v8  ;;  %s1781_s26 = scalar_lea.sflag [#allocation4], %s2510_s0  ;;  %s2257_s27 = scalar_lea.vmem %s1796_s1, 256 }
  0x78   : > { %v355_v21 = vunpack.c.0.s8 %v354_v16  ;;  %p2258_p12 = scmp.ne.s32.totalorder %s1796_s1, %s2257_s27  ;;  %p2873_p6 = scmp.ne.s32.totalorder %s2862_s23, 0 }
  0x79   : > { %v2583_v19 = vsub.s32 %v291_v12, %v293_v13  ;;  %s2337_s16 = smov [#allocation8]  }
  0x7a   : > { %v2590_v28 = vsub.s32 %v355_v21, %v293_v13  ;;  %p2259_p8 = pnand %p2258_p12, %p2873_p6  ;;  %s2261_s17 = sshll.u32 %s2337_s16, 4  ;;  %s2262_s17 = int_to_ptr.vmem [resolvable:$false] %s2261_s17 }
  0x7b   : > { %440 = vrot.lane.b32.xlu1 %v2533_v1, %s2330_s7  ;;  %437 = vrot.lane.b32.xlu0 %v2533_v1, %s2332_s6  ;;  %s2263_s20 = scalar_lea.vmem %s2262_s17, 512  ;;  %p2264_p0 = scmp.lt.s32.totalorder %s1796_s1, %s2262_s17 }
  0x7c   : > { %p2260_p9 = pneg %p2259_p8  ;;  %p2265_p2 = scmp.lt.s32.totalorder %s2263_s20, %s2257_s27 }
  0x7e   : > { %p2266_p13 = por %p2265_p2, %p2264_p0 }
  0x7f   : > { %271 = vrot.lane.b32.xlu1 %v2543_v2, %s2332_s6  ;;  %268 = vrot.lane.b32.xlu0 %v2543_v2, %s2331_s4 }
  0x80   : > { %p2267_p3 = pnand %p2266_p13, %p2260_p9 }
  0x83   : > { %278 = vrot.lane.b32.xlu1 %v2551_v4, %s2331_s4  ;;  %274 = vrot.lane.b32.xlu0 %v2543_v2, %s2330_s7 }
  0x87   : > { %284 = vrot.lane.b32.xlu1 %v2551_v4, %s2330_s7  ;;  %281 = vrot.lane.b32.xlu0 %v2551_v4, %s2332_s6 }
  0x8b   : > { %580 = vrot.lane.b32.xlu1 %v2566_v5, %s2331_s4  ;;  %583 = vrot.lane.b32.xlu0 %v2566_v5, %s2332_s6 }
  0x8f   : > { %586 = vrot.lane.b32.xlu1 %v2566_v5, %s2330_s7 }
  0x93   : > { %590 = vrot.lane.b32.xlu1 %v2574_v6, %s2331_s4 }
  0xe5   : > { %v2578_v10 = vpop.permute.xlu1 %430  ;;  %v2580_v11 = vpop.permute.xlu0 %424 }
  0xe6   : > { %v459_v20 = vcombine.low %v2580_v11, %v2578_v10  ;;  %v460_v56 = vcombine.high %v2580_v11, %v2578_v10 }
  0xe8   : > { %v467_v25 = vrot.slane %v459_v20, %v2583_v19  ;;  %v474_v13 = vrot.slane %v460_v56, %v2583_v19 }
  0xe9   : > { %v435_v14 = vpop.permute.xlu1 %434  ;;  %v428_v17 = vpop.permute.xlu0 %427 }
  0xea   : > { %v443_v18 = vcombine.low %v2527_v0, %v428_v17  ;;  %v444_v53 = vcombine.high %v2527_v0, %v428_v17 }
  0xec   : > { %v451_v22 = vrot.slane %v443_v18, %v2583_v19  ;;  %v458_v7 = vrot.slane %v444_v53, %v2583_v19 }
  0xed   : > { %v441_v23 = vpop.permute.xlu1 %440  ;;  %v438_v24 = vpop.permute.xlu0 %437 }
  0xee   : > { %v491_v26 = vcombine.low %v435_v14, %v441_v23  ;;  %v475_v27 = vcombine.low %v2533_v1, %v438_v24  ;;  %v507_v29 = vcombine.low %v451_v22, %v467_v25  ;;  %v492_v43 = vcombine.high %v435_v14, %v441_v23 }
  0xef   : > { %v476_v46 = vcombine.high %v2533_v1, %v438_v24  ;;  %v508_v54 = vcombine.high %v451_v22, %v467_v25  ;;  %v523_v20 = vcombine.low %v458_v7, %v474_v13 }
  0xf0   : > { %v499_v30 = vrot.slane %v491_v26, %v2583_v19  ;;  %v483_v31 = vrot.slane %v475_v27, %v2583_v19  ;;  %v515_v37 = vrot.slane %v507_v29, %v2590_v28  ;;  %v2608_v57 = vrot.slane %v492_v43, %v2583_v19 }
  0xf1   : > { %v2594_v32 = vpop.permute.xlu1 %271  ;;  %v269_v33 = vpop.permute.xlu0 %268  ;;  %v490_v60 = vrot.slane %v476_v46, %v2583_v19  ;;  %v522_v8 = vrot.slane %v508_v54, %v2590_v28 }
  0xf2   : > { %v539_v34 = vcombine.low %v483_v31, %v499_v30  ;;  %v287_v42 = vcombine.low %v2543_v2, %v2594_v32  ;;  %v540_v50 = vcombine.high %v483_v31, %v499_v30 }
  0xf3   : > { %v555_v14 = vcombine.low %v490_v60, %v2608_v57 }
  0xf4   : > { %v547_v38 = vrot.slane %v539_v34, %v2590_v28  ;;  %v295_v55 = vrot.slane %v287_v42, %v2583_v19  ;;  %v554_v0 = vrot.slane %v540_v50, %v2590_v28  ;;  %v531_v34 = vrot.slane %v523_v20, %v2590_v28 }
  0xf5   : > { %v279_v35 = vpop.permute.xlu1 %278  ;;  %v275_v36 = vpop.permute.xlu0 %274  ;;  %v563_v27 = vrot.slane %v555_v14, %v2590_v28 }
  0xf6   : > { %v303_v39 = vcombine.low %v269_v33, %v275_v36  ;;  %v571_v40 = vcombine.low %v515_v37, %v547_v38  ;;  %v572_v41 = vcombine.high %v515_v37, %v547_v38  ;;  %v304_v16 = vcombine.high %v269_v33, %v275_v36 }
  0xf7   : > { %v573_v18 = vcombine.low %v522_v8, %v554_v0  ;;  %v574_v23 = vcombine.high %v522_v8, %v554_v0  ;;  %v576_v46 = vcombine.high %v531_v34, %v563_v27 }
  0xf8   : > { %v311_v47 = vrot.slane %v303_v39, %v2583_v19  ;;  %v751_v48 = vpack.c.bf16 %v571_v40, %v571_v40  ;;  %v752_v49 = vpack.c.bf16 %v572_v41, %v572_v41  ;;  %v318_v29 = vrot.slane %v304_v16, %v2583_v19 }
  0xf9   : > { %v285_v44 = vpop.permute.xlu1 %284  ;;  %v282_v45 = vpop.permute.xlu0 %281  ;;  %v753_v33 = vpack.c.bf16 %v573_v18, %v573_v18  ;;  %v754_v36 = vpack.c.bf16 %v574_v23, %v574_v23  ;;  %v556_v41 = vcombine.high %v490_v60, %v2608_v57  ;;  %v756_v54 = vpack.c.bf16 %v576_v46, %v576_v46 }
  0xfa   : > { %v335_v51 = vcombine.low %v279_v35, %v285_v44  ;;  %v319_v52 = vcombine.low %v2551_v4, %v282_v45  ;;  %v351_v61 = vcombine.low %v295_v55, %v311_v47  ;;  %v764_v62 = vsel %vm759_vm1, %v751_v48, 0 }
  0xfb   : > { %v810_v63 = vsel %vm759_vm1, %v752_v49, 0  ;;  %1983 = vmatpush3.bf16.xpose.msra.mxu0 %v764_v62  ;;  %v336_v9 = vcombine.high %v279_v35, %v285_v44  ;;  %v320_v10 = vcombine.high %v2551_v4, %v282_v45  ;;  %v352_v17 = vcombine.high %v295_v55, %v311_v47 }
  0xfc   : > { %v343_v58 = vrot.slane %v335_v51, %v2583_v19  ;;  %v327_v59 = vrot.slane %v319_v52, %v2583_v19  ;;  %1989 = vmatpush3.bf16.xpose.msra.mxu1 %v810_v63  ;;  %1994 = vmatprep.subr.bf16.mxu0 %v2333_v3  ;;  %v359_v15 = vrot.slane %v351_v61, %v2590_v28  ;;  %v856_v43 = vsel %vm759_vm1, %v753_v33, 0 }
  0xfd   : > { %2000 = vmatprep.subr.bf16.mxu1 %v2333_v3  ;;  %v288_v4 = vcombine.high %v2543_v2, %v2594_v32  ;;  %v350_v24 = vrot.slane %v336_v9, %v2583_v19  ;;  %v334_v25 = vrot.slane %v320_v10, %v2583_v19  ;;  %v366_v30 = vrot.slane %v352_v17, %v2590_v28 }
  0xfe   : > { %v383_v1 = vcombine.low %v327_v59, %v343_v58  ;;  %v384_v11 = vcombine.high %v327_v59, %v343_v58  ;;  %v575_v44 = vcombine.low %v531_v34, %v563_v27  ;;  %v902_v45 = vsel %vm759_vm1, %v754_v36, 0 }
  0xff   : > { %v302_v2 = vrot.slane %v288_v4, %v2583_v19  ;;  %v399_v32 = vcombine.low %v334_v25, %v350_v24  ;;  %v524_v47 = vcombine.high %v458_v7, %v474_v13  ;;  %v570_v51 = vrot.slane %v556_v41, %v2590_v28 }
 0x100   : > { %v391_v12 = vrot.slane %v383_v1, %v2590_v28  ;;  %v398_v26 = vrot.slane %v384_v11, %v2590_v28  ;;  %v755_v53 = vpack.c.bf16 %v575_v44, %v575_v44  ;;  %v400_v56 = vcombine.high %v334_v25, %v350_v24 }
 0x101   : > { %v367_v42 = vcombine.low %v302_v2, %v318_v29  ;;  %v407_v48 = vrot.slane %v399_v32, %v2590_v28  ;;  %v538_v55 = vrot.slane %v524_v47, %v2590_v28  ;;  %v368_v61 = vcombine.high %v302_v2, %v318_v29 }
 0x102   : > { %v415_v21 = vcombine.low %v359_v15, %v391_v12  ;;  %v416_v22 = vcombine.high %v359_v15, %v391_v12  ;;  %v417_v37 = vcombine.low %v366_v30, %v398_v26  ;;  %v418_v39 = vcombine.high %v366_v30, %v398_v26 }
 0x103   : > { %v375_v52 = vrot.slane %v367_v42, %v2590_v28  ;;  %v948_v62 = vsel %vm759_vm1, %v755_v53, 0  ;;  %v577_v63 = vcombine.low %v538_v55, %v570_v51  ;;  %v994_v0 = vsel %vm759_vm1, %v756_v54, 0 }
 0x104   : > { %v735_v31 = vmul.f32 0.17677669, %v415_v21  ;;  %v736_v35 = vmul.f32 0.17677669, %v416_v22  ;;  %v737_v49 = vmul.f32 0.17677669, %v417_v37  ;;  %v578_v1 = vcombine.high %v538_v55, %v570_v51 }
 0x105   : > { %v738_v50 = vmul.f32 0.17677669, %v418_v39  ;;  %v419_v57 = vcombine.low %v375_v52, %v407_v48  ;;  %v420_v59 = vcombine.high %v375_v52, %v407_v48  ;;  %v414_v7 = vrot.slane %v400_v56, %v2590_v28 }
 0x106   : > { %v743_v38 = vpack.c.bf16 %v735_v31, %v735_v31  ;;  %v744_v40 = vpack.c.bf16 %v736_v35, %v736_v35  ;;  %v745_v58 = vpack.c.bf16 %v737_v49, %v737_v49  ;;  %v382_v10 = vrot.slane %v368_v61, %v2590_v28 }
 0x107   : > { %v746_v60 = vpack.c.bf16 %v738_v50, %v738_v50  ;;  %v739_v8 = vmul.f32 0.17677669, %v419_v57  ;;  %v740_v9 = vmul.f32 0.17677669, %v420_v59  ;;  %v757_v11 = vpack.c.bf16 %v577_v63, %v577_v63  ;;  %v581_v63 = vpop.permute.xlu1 %580 }
 0x108   : > { %1985 = vmatmul.mubr.msk.bf16.vlgmr.msra.gmra.mxu0 %vm759_vm1, %v743_v38  ;;  %1991 = vmatmul.mubr.msk.bf16.vlgmr.msra.gmra.mxu1 %vm759_vm1, %v744_v40  ;;  %v758_v12 = vpack.c.bf16 %v578_v1, %v578_v1  ;;  %v421_v13 = vcombine.low %v382_v10, %v414_v7  ;;  %v422_v15 = vcombine.high %v382_v10, %v414_v7  ;;  %v584_v1 = vpop.permute.xlu0 %583 }
 0x109   : > { %1995 = vmatpush3.bf16.xpose.msra.mxu0 %v856_v43  ;;  %2001 = vmatpush3.bf16.xpose.msra.mxu1 %v902_v45  ;;  %v747_v14 = vpack.c.bf16 %v739_v8, %v739_v8  ;;  %v748_v16 = vpack.c.bf16 %v740_v9, %v740_v9  ;;  %v1040_v17 = vsel %vm759_vm1, %v757_v11, 0 }
 0x10a   : > { %1996 = vmatprep.mubr.msk.bf16.mxu0 %vm2334_vm0, %v2333_v3  ;;  %2002 = vmatprep.mubr.msk.bf16.mxu1 %vm2334_vm0, %v2333_v3  ;;  %v1086_v18 = vsel %vm759_vm1, %v758_v12, 0  ;;  %v741_v20 = vmul.f32 0.17677669, %v421_v13  ;;  %v742_v21 = vmul.f32 0.17677669, %v422_v15 }
 0x10b   : > { %2006 = vmatprep.subr.bf16.mxu0 %v2333_v3  ;;  %2012 = vmatprep.subr.bf16.mxu1 %v2333_v3 }
 0x10c   : > { %v749_v22 = vpack.c.bf16 %v741_v20, %v741_v20  ;;  %v750_v23 = vpack.c.bf16 %v742_v21, %v742_v21 }
 0x110   : > { %1997 = vmatmul.mubr.msk.bf16.vlgmr.msra.gmra.mxu0 %vm759_vm1, %v745_v58  ;;  %2003 = vmatmul.mubr.msk.bf16.vlgmr.msra.gmra.mxu1 %vm759_vm1, %v746_v60 }
 0x111   : > { %2007 = vmatpush3.bf16.xpose.msra.mxu0 %v948_v62  ;;  %2013 = vmatpush3.bf16.xpose.msra.mxu1 %v994_v0  ;;  %v587_v0 = vpop.permute.xlu1 %586 }
 0x112   : > { %2008 = vmatprep.mubr.msk.bf16.mxu0 %vm2334_vm0, %v2333_v3  ;;  %2014 = vmatprep.mubr.msk.bf16.mxu1 %vm2334_vm0, %v2333_v3 }
 0x113   : > { %2018 = vmatprep.subr.bf16.mxu0 %v2333_v3  ;;  %2024 = vmatprep.subr.bf16.mxu1 %v2333_v3 }
 0x115   : > { %v591_v7 = vpop.permute.xlu1 %590 }
 0x118   : > { %2009 = vmatmul.mubr.msk.bf16.vlgmr.msra.gmra.mxu0 %vm759_vm1, %v747_v14  ;;  %2015 = vmatmul.mubr.msk.bf16.vlgmr.msra.gmra.mxu1 %vm759_vm1, %v748_v16  ;;  %v615_v16 = vcombine.low %v581_v63, %v587_v0 }
 0x119   : > { %2019 = vmatpush3.bf16.xpose.msra.mxu0 %v1040_v17  ;;  %2025 = vmatpush3.bf16.xpose.msra.mxu1 %v1086_v18  ;;  %v599_v17 = vcombine.low %v2566_v5, %v584_v1 }
 0x11a   : > { %2020 = vmatprep.mubr.msk.bf16.mxu0 %vm2334_vm0, %v2333_v3  ;;  %2026 = vmatprep.mubr.msk.bf16.mxu1 %vm2334_vm0, %v2333_v3 }
 0x11b   : > { %2030 = vmatprep.subr.bf16.mxu0 %v2333_v3  ;;  %2036 = vmatprep.subr.bf16.mxu1 %v2333_v3 }
 0x120   : > { %2021 = vmatmul.mubr.msk.bf16.vlgmr.msra.gmra.mxu0 %vm759_vm1, %v749_v22  ;;  %2027 = vmatmul.mubr.msk.bf16.vlgmr.msra.gmra.mxu1 %vm759_vm1, %v750_v23  ;;  %v623_v23 = vrot.slane %v615_v16, %v2583_v19 }
 0x121   : > { %2032 = vmatprep.mubr.msk.bf16.mxu0 %vm2334_vm0, %v2333_v3  ;;  %2038 = vmatprep.mubr.msk.bf16.mxu1 %vm2334_vm0, %v2333_v3 }
 0x1c8   : > { %v800_v4 = vpop.f32.mrf.mxu0  ;;  %v846_v24 = vpop.f32.mrf.mxu1 }
 0x1c9   : > { %v1129_v25 = vsel %vm1128_vm2, %v800_v4, -inf  ;;  %v1132_v26 = vsel %vm1128_vm2, %v846_v24, -inf }
 0x1ca   : > { %1130 = vmax.xlane.f32.xlu0 %v1129_v25  ;;  %v1986_v27 = vpop.f32.mrf.mxu0  ;;  %1133 = vmax.xlane.f32.xlu1 %v1132_v26  ;;  %v1992_v29 = vpop.f32.mrf.mxu1  ;;  %v607_v25 = vrot.slane %v599_v17, %v2583_v19 }
 0x1cc   : > { %v803_v30 = vpop.f32.mrf.mxu0  ;;  %v849_v31 = vpop.f32.mrf.mxu1 }
 0x1cd   : > { %v616_v31 = vcombine.high %v581_v63, %v587_v0 }
 0x1ce   : > { %v1987_v33 = vpop.f32.mrf.mxu0  ;;  %v1993_v34 = vpop.f32.mrf.mxu1 }
 0x1cf   : > { %v600_v33 = vcombine.high %v2566_v5, %v584_v1  ;;  %v663_v34 = vcombine.low %v607_v25, %v623_v23  ;;  %v2716_v5 = vrot.slane %v616_v31, %v2583_v19 }
 0x1d0   : > { %v892_v35 = vpop.f32.mrf.mxu0  ;;  %v938_v36 = vpop.f32.mrf.mxu1 }
 0x1d1   : > { %v1135_v2 = vsel %vm1128_vm2, %v892_v35, -inf  ;;  %v1138_v40 = vsel %vm1128_vm2, %v938_v36, -inf }
 0x1d2   : > { %1136 = vmax.xlane.f32.xlu0 %v1135_v2  ;;  %v1998_v32 = vpop.f32.mrf.mxu0  ;;  %v2004_v37 = vpop.f32.mrf.mxu1 }
 0x1d4   : > { %v895_v38 = vpop.f32.mrf.mxu0  ;;  %v941_v39 = vpop.f32.mrf.mxu1 }
 0x1d6   : > { %1139 = vmax.xlane.f32.xlu0 %v1138_v40  ;;  %v1999_v41 = vpop.f32.mrf.mxu0  ;;  %v2005_v42 = vpop.f32.mrf.mxu1 }
 0x1d7   : > { %v2719_v42 = vrot.slane %v600_v33, %v2583_v19 }
 0x1d8   : > { %v2682_v43 = vpop.f32.mrf.mxu0  ;;  %v2684_v44 = vpop.f32.mrf.mxu1 }
 0x1d9   : > { %v1144_v59 = vsel %vm1128_vm2, %v2684_v44, -inf  ;;  %v1141_v60 = vsel %vm1128_vm2, %v2682_v43, -inf }
 0x1da   : > { %v2010_v45 = vpop.f32.mrf.mxu0  ;;  %v2016_v46 = vpop.f32.mrf.mxu1 }
 0x1db   : > { %596 = vrot.lane.b32.xlu1 %v2574_v6, %s2330_s7  ;;  %v671_v46 = vrot.slane %v663_v34, %v2590_v28 }
 0x1dc   : > { %v987_v47 = vpop.f32.mrf.mxu0  ;;  %v1033_v48 = vpop.f32.mrf.mxu1 }
 0x1de   : > { %v2011_v49 = vpop.f32.mrf.mxu0  ;;  %v2017_v50 = vpop.f32.mrf.mxu1 }
 0x1e0   : > { %v2688_v51 = vpop.f32.mrf.mxu0  ;;  %v2690_v52 = vpop.f32.mrf.mxu1 }
 0x1e1   : > { %v1147_v61 = vsel %vm1128_vm2, %v2688_v51, -inf  ;;  %v1150_v62 = vsel %vm1128_vm2, %v2690_v52, -inf }
 0x1e2   : > { %v2022_v53 = vpop.f32.mrf.mxu0  ;;  %v2028_v54 = vpop.f32.mrf.mxu1 }
 0x1e4   : > { %v1079_v55 = vpop.f32.mrf.mxu0  ;;  %v1125_v56 = vpop.f32.mrf.mxu1 }
 0x1e6   : > { %v2023_v57 = vpop.f32.mrf.mxu0  ;;  %v2029_v58 = vpop.f32.mrf.mxu1 }
 0x1e7   : > { %v679_v58 = vcombine.low %v2719_v42, %v2716_v5 }
 0x1ec   : > { %593 = vrot.lane.b32.xlu0 %v2574_v6, %s2332_s6 }
 0x1ff   : > { %1145 = vmax.xlane.f32.xlu1 %v1144_v59 }
 0x20b   : > { %1142 = vmax.xlane.f32.xlu0 %v1141_v60 }
 0x20f   : > { %1148 = vmax.xlane.f32.xlu0 %v1147_v61 }
 0x213   : > { %1151 = vmax.xlane.f32.xlu0 %v1150_v62 }
 0x253   : > { %v1131_v8 = vpop.xlane.xlu0 %1130  ;;  %v1134_v9 = vpop.xlane.xlu1 %1133 }
 0x254   : > { %v1153_v10 = vsub.f32 %v800_v4, %v1131_v8  ;;  %v1154_v11 = vsub.f32 %v846_v24, %v1134_v9  ;;  %v687_v9 = vrot.slane %v679_v58, %v2590_v28 }
 0x256   : > { %v1161_v12 = vmul.f32 1.442695, %v1153_v10  ;;  %v1163_v13 = vmul.f32 1.442695, %v1154_v11 }
 0x257   : > { %v597_v20 = vpop.permute.xlu1 %596 }
 0x258   : > { %2141 = vpow2.f32 %v1161_v12  ;;  %v647_v4 = vcombine.low %v591_v7, %v597_v20 }
 0x259   : > { %2143 = vpow2.f32 %v1163_v13 }
 0x25a   : > { %v655_v32 = vrot.slane %v647_v4, %v2583_v19 }
 0x25b   : > { %v1137_v14 = vpop.xlane.xlu0 %1136 }
 0x25c   : > { %v1155_v15 = vsub.f32 %v892_v35, %v1137_v14  ;;  %v648_v35 = vcombine.high %v591_v7, %v597_v20 }
 0x25e   : > { %v1165_v18 = vmul.f32 1.442695, %v1155_v15  ;;  %v2722_v45 = vrot.slane %v648_v35, %v2583_v19 }
 0x25f   : > { %v1140_v21 = vpop.xlane.xlu0 %1139 }
 0x260   : > { %2145 = vpow2.f32 %v1165_v18  ;;  %v1156_v22 = vsub.f32 %v938_v36, %v1140_v21  ;;  %v664_v36 = vcombine.high %v607_v25, %v623_v23 }
 0x262   : > { %v1167_v24 = vmul.f32 1.442695, %v1156_v22  ;;  %v678_v47 = vrot.slane %v664_v36, %v2590_v28 }
 0x263   : > { %v594_v26 = vpop.permute.xlu0 %593 }
 0x264   : > { %2147 = vpow2.f32 %v1167_v24  ;;  %v631_v27 = vcombine.low %v2574_v6, %v594_v26  ;;  %v632_v29 = vcombine.high %v2574_v6, %v594_v26 }
 0x265   : > { %v2142_v30 = vpop.eup %2141 }
 0x266   : > { %v2144_v2 = vpop.eup %2143  ;;  %v639_v37 = vrot.slane %v631_v27, %v2583_v19  ;;  %v1177_v38 = vsel %vm1128_vm2, %v2142_v30, 0.0  ;;  %v2712_v39 = vrot.slane %v632_v29, %v2583_v19  ;;  %v1217_v11 = vpack.c.bf16 %v2142_v30, %v2142_v30 }
 0x267   : > { %v1180_v40 = vsel %vm1128_vm2, %v2144_v2, 0.0  ;;  %1178 = vadd.xlane.f32.xlu1 %v1177_v38  ;;  %v1218_v12 = vpack.c.bf16 %v2144_v2, %v2144_v2  ;;  %v680_v27 = vcombine.high %v2719_v42, %v2716_v5 }
 0x268   : > { %v695_v6 = vcombine.low %v639_v37, %v655_v32  ;;  %v696_v41 = vcombine.high %v639_v37, %v655_v32  ;;  %1181 = vadd.xlane.f32.xlu0 %v1180_v40  ;;  %v711_v50 = vcombine.low %v2712_v39, %v2722_v45  ;;  %v712_v26 = vcombine.high %v2712_v39, %v2722_v45 }
 0x269   : > { %v694_v30 = vrot.slane %v680_v27, %v2590_v28 }
 0x26a   : > { %v703_v48 = vrot.slane %v695_v6, %v2590_v28  ;;  %v710_v49 = vrot.slane %v696_v41, %v2590_v28  ;;  %v719_v62 = vrot.slane %v711_v50, %v2590_v28  ;;  %v726_v29 = vrot.slane %v712_v26, %v2590_v28 }
 0x26c   : > { %v727_v53 = vcombine.low %v671_v46, %v703_v48  ;;  %v728_v54 = vcombine.high %v671_v46, %v703_v48  ;;  %v729_v55 = vcombine.low %v678_v47, %v710_v49  ;;  %v730_v56 = vcombine.high %v678_v47, %v710_v49 }
 0x26d   : > { %v2146_v57 = vpop.eup %2145  ;;  %v731_v15 = vcombine.low %v687_v9, %v719_v62  ;;  %v732_v16 = vcombine.high %v687_v9, %v719_v62  ;;  %v734_v34 = vcombine.high %v694_v30, %v726_v29 }
 0x26e   : > { %v1183_v59 = vsel %vm1128_vm2, %v2146_v57, 0.0  ;;  %v1225_v60 = vpack.c.bf16 %v727_v53, %v727_v53  ;;  %v1226_v61 = vpack.c.bf16 %v728_v54, %v728_v54  ;;  %v1227_v1 = vpack.c.bf16 %v729_v55, %v729_v55 }
 0x26f   : > { %1184 = vadd.xlane.f32.xlu1 %v1183_v59  ;;  %v1228_v7 = vpack.c.bf16 %v730_v56, %v730_v56  ;;  %v1229_v17 = vpack.c.bf16 %v731_v15, %v731_v15  ;;  %v1230_v18 = vpack.c.bf16 %v732_v16, %v732_v16  ;;  %v1219_v20 = vpack.c.bf16 %v2146_v57, %v2146_v57 }
 0x270   : > { %v1238_v63 = vsel %vm1236_vm3, %v1225_v60, 0  ;;  %v1284_v0 = vsel %vm1236_vm3, %v1226_v61, 0  ;;  %v1330_v13 = vsel %vm1236_vm3, %v1227_v1, 0  ;;  %v1232_v36 = vpack.c.bf16 %v734_v34, %v734_v34 }
 0x271   : > { %v2148_v8 = vpop.eup %2147  ;;  %2031 = vmatpush3.bf16.msra.mxu0 %v1238_v63  ;;  %2037 = vmatpush3.bf16.msra.mxu1 %v1284_v0  ;;  %v1376_v14 = vsel %vm1236_vm3, %v1228_v7, 0  ;;  %v1422_v22 = vsel %vm1236_vm3, %v1229_v17, 0  ;;  %v1468_v23 = vsel %vm1236_vm3, %v1230_v18, 0 }
 0x272   : > { %v1186_v10 = vsel %vm1128_vm2, %v2148_v8, 0.0  ;;  %2042 = vmatprep.subr.bf16.mxu0 %v2333_v3  ;;  %2048 = vmatprep.subr.bf16.mxu1 %v2333_v3  ;;  %v1220_v21 = vpack.c.bf16 %v2148_v8, %v2148_v8 }
 0x273   : > { %1187 = vadd.xlane.f32.xlu0 %v1186_v10 }
 0x274   : > { %2033 = vmatmul.mubr.msk.bf16.vlgmr.msra.gmra.mxu0 %vm1128_vm2, %v1217_v11  ;;  %2039 = vmatmul.mubr.msk.bf16.vlgmr.msra.gmra.mxu1 %vm1128_vm2, %v1218_v12 }
 0x275   : > { %2043 = vmatpush3.bf16.msra.mxu0 %v1330_v13  ;;  %2049 = vmatpush3.bf16.msra.mxu1 %v1376_v14 }
 0x276   : > { %2044 = vmatprep.mubr.msk.bf16.mxu0 %vm2334_vm0, %v2333_v3  ;;  %2050 = vmatprep.mubr.msk.bf16.mxu1 %vm2334_vm0, %v2333_v3 }
 0x277   : > { %2054 = vmatprep.subr.bf16.mxu0 %v2333_v3  ;;  %2060 = vmatprep.subr.bf16.mxu1 %v2333_v3 }
 0x27c   : > { %2045 = vmatmul.mubr.msk.bf16.vlgmr.msra.gmra.mxu0 %vm1128_vm2, %v1219_v20  ;;  %2051 = vmatmul.mubr.msk.bf16.vlgmr.msra.gmra.mxu1 %vm1128_vm2, %v1220_v21 }
 0x27d   : > { %2055 = vmatpush3.bf16.msra.mxu0 %v1422_v22  ;;  %2061 = vmatpush3.bf16.msra.mxu1 %v1468_v23 }
 0x27e   : > { %2062 = vmatprep.mubr.msk.bf16.mxu1 %vm2334_vm0, %v2333_v3  ;;  %2072 = vmatprep.subr.bf16.mxu1 %v2333_v3 }
 0x27f   : > { %2056 = vmatprep.mubr.msk.bf16.mxu0 %vm2334_vm0, %v2333_v3  ;;  %2066 = vmatprep.subr.bf16.mxu0 %v2333_v3 }
 0x288   : > { %v1146_v25 = vpop.xlane.xlu1 %1145 }
 0x289   : > { %v1158_v4 = vsub.f32 %v2684_v44, %v1146_v25 }
 0x28b   : > { %v1171_v24 = vmul.f32 1.442695, %v1158_v4 }
 0x28d   : > { %2149 = vpow2.f32 %v1171_v24 }
 0x294   : > { %v1143_v31 = vpop.xlane.xlu0 %1142 }
 0x295   : > { %v1157_v33 = vsub.f32 %v2682_v43, %v1143_v31  ;;  %v1560_v43 = vsel %vm1236_vm3, %v1232_v36, 0 }
 0x297   : > { %v1169_v35 = vmul.f32 1.442695, %v1157_v33 }
 0x298   : > { %v1149_v2 = vpop.xlane.xlu0 %1148 }
 0x299   : > { %2151 = vpow2.f32 %v1169_v35  ;;  %v1159_v44 = vsub.f32 %v2688_v51, %v1149_v2  ;;  %v733_v51 = vcombine.low %v694_v30, %v726_v29 }
 0x29a   : > { %v2150_v32 = vpop.eup %2149 }
 0x29b   : > { %v1173_v37 = vmul.f32 1.442695, %v1159_v44  ;;  %v1192_v38 = vsel %vm1128_vm2, %v2150_v32, 0.0  ;;  %v1222_v40 = vpack.c.bf16 %v2150_v32, %v2150_v32  ;;  %v1231_v5 = vpack.c.bf16 %v733_v51, %v733_v51 }
 0x29c   : > { %v1152_v39 = vpop.xlane.xlu0 %1151  ;;  %1193 = vadd.xlane.f32.xlu0 %v1192_v38 }
 0x29d   : > { %2153 = vpow2.f32 %v1173_v37  ;;  %v1160_v6 = vsub.f32 %v2690_v52, %v1152_v39  ;;  %2063 = vmatmul.mubr.msk.bf16.vlgmr.msra.gmra.mxu1 %vm1128_vm2, %v1222_v40  ;;  %v1514_v52 = vsel %vm1236_vm3, %v1231_v5, 0 }
 0x29e   : > { %2073 = vmatpush3.bf16.msra.mxu1 %v1560_v43  ;;  %2074 = vmatprep.mubr.msk.bf16.mxu1 %vm2334_vm0, %v2333_v3 }
 0x29f   : > { %v1175_v41 = vmul.f32 1.442695, %v1160_v6 }
 0x2a1   : > { %2155 = vpow2.f32 %v1175_v41 }
 0x2a6   : > { %v2152_v42 = vpop.eup %2151 }
 0x2a7   : > { %v1189_v45 = vsel %vm1128_vm2, %v2152_v42, 0.0  ;;  %v1221_v46 = vpack.c.bf16 %v2152_v42, %v2152_v42 }
 0x2a8   : > { %1190 = vadd.xlane.f32.xlu1 %v1189_v45 }
 0x2a9   : > { %2057 = vmatmul.mubr.msk.bf16.vlgmr.msra.gmra.mxu0 %vm1128_vm2, %v1221_v46 }
 0x2aa   : > { %v2154_v47 = vpop.eup %2153  ;;  %2067 = vmatpush3.bf16.msra.mxu0 %v1514_v52  ;;  %2068 = vmatprep.mubr.msk.bf16.mxu0 %vm2334_vm0, %v2333_v3 }
 0x2ab   : > { %v1195_v48 = vsel %vm1128_vm2, %v2154_v47, 0.0  ;;  %v1223_v53 = vpack.c.bf16 %v2154_v47, %v2154_v47 }
 0x2ac   : > { %1196 = vadd.xlane.f32.xlu1 %v1195_v48 }
 0x2ae   : > { %v2156_v49 = vpop.eup %2155 }
 0x2af   : > { %v1198_v50 = vsel %vm1128_vm2, %v2156_v49, 0.0  ;;  %v1224_v54 = vpack.c.bf16 %v2156_v49, %v2156_v49 }
 0x2b0   : > { %1199 = vadd.xlane.f32.xlu0 %v1198_v50 }
 0x2b1   : > { %2069 = vmatmul.mubr.msk.bf16.vlgmr.msra.gmra.mxu0 %vm1128_vm2, %v1223_v53  ;;  %2075 = vmatmul.mubr.msk.bf16.vlgmr.msra.gmra.mxu1 %vm1128_vm2, %v1224_v54 }
 0x2f0   : > { %v1179_v11 = vpop.xlane.xlu1 %1178 }
 0x2f1   : > { %v1182_v12 = vpop.xlane.xlu0 %1181 }
 0x2f8   : > { %v1185_v13 = vpop.xlane.xlu1 %1184 }
 0x2f9   : > { %2157 = vrcp.f32 %v1185_v13 }
 0x2fc   : > { %v1188_v14 = vpop.xlane.xlu0 %1187 }
 0x2fd   : > { %2159 = vrcp.f32 %v1188_v14 }
 0x2fe   : > { %2161 = vrcp.f32 %v1179_v11 }
 0x2ff   : > { %2163 = vrcp.f32 %v1182_v12 }
 0x306   : > { %v2158_v25 = vpop.eup %2157 }
 0x30a   : > { %v2160_v4 = vpop.eup %2159 }
 0x30b   : > { %v2162_v24 = vpop.eup %2161 }
 0x30c   : > { %v2164_v30 = vpop.eup %2163 }
 0x325   : > { %v1194_v16 = vpop.xlane.xlu0 %1193 }
 0x326   : > { %2165 = vrcp.f32 %v1194_v16 }
 0x331   : > { %v1191_v15 = vpop.xlane.xlu1 %1190 }
 0x332   : > { %2167 = vrcp.f32 %v1191_v15 }
 0x333   : > { %v2166_v37 = vpop.eup %2165 }
 0x334   : > { %v1274_v55 = vpop.f32.mrf.mxu0  ;;  %v1320_v56 = vpop.f32.mrf.mxu1 }
 0x335   : > { %v1197_v18 = vpop.xlane.xlu1 %1196  ;;  %v1602_v31 = vmul.f32 %v2162_v24, %v1274_v55  ;;  %v1603_v33 = vmul.f32 %v2164_v30, %v1320_v56 }
 0x336   : > { %v2034_v57 = vpop.f32.mrf.mxu0  ;;  %v2040_v58 = vpop.f32.mrf.mxu1  ;;  %2169 = vrcp.f32 %v1197_v18 }
 0x338   : > { %v1277_v59 = vpop.f32.mrf.mxu0  ;;  %v1323_v60 = vpop.f32.mrf.mxu1 }
 0x339   : > { %v1200_v21 = vpop.xlane.xlu0 %1199 }
 0x33a   : > { %v2035_v3 = vpop.f32.mrf.mxu0  ;;  %v2041_v61 = vpop.f32.mrf.mxu1  ;;  %2171 = vrcp.f32 %v1200_v21 }
 0x33c   : > { %v1366_v62 = vpop.f32.mrf.mxu0  ;;  %v1412_v63 = vpop.f32.mrf.mxu1 }
 0x33d   : > { %v1604_v26 = vmul.f32 %v2158_v25, %v1366_v62  ;;  %v1605_v27 = vmul.f32 %v2160_v4, %v1412_v63 }
 0x33e   : > { %v2046_v0 = vpop.f32.mrf.mxu0  ;;  %v2052_v1 = vpop.f32.mrf.mxu1 }
 0x33f   : > { %v1610_v35 = vcombine.low %v1602_v31, %v1604_v26  ;;  %v1611_v2 = vcombine.high %v1602_v31, %v1604_v26  ;;  %v1626_v44 = vcombine.low %v1603_v33, %v1605_v27  ;;  %v1627_v36 = vcombine.high %v1603_v33, %v1605_v27  ;;  %v2168_v38 = vpop.eup %2167 }
 0x340   : > { %v1369_v7 = vpop.f32.mrf.mxu0  ;;  %v1415_v8 = vpop.f32.mrf.mxu1 }
 0x341   : > { %v1618_v43 = vrot.slane %v1610_v35, %v2583_v19  ;;  %v1625_v41 = vrot.slane %v1611_v2, %v2583_v19  ;;  %v1634_v51 = vrot.slane %v1626_v44, %v2583_v19  ;;  %v1641_v5 = vrot.slane %v1627_v36, %v2583_v19 }
 0x342   : > { %v2047_v9 = vpop.f32.mrf.mxu0  ;;  %v2053_v10 = vpop.f32.mrf.mxu1 }
 0x343   : > { %v2170_v40 = vpop.eup %2169  ;;  %v1674_v57 = vcombine.low %v1618_v43, %v1634_v51  ;;  %v1690_v58 = vcombine.low %v1625_v41, %v1641_v5  ;;  %v1675_v10 = vcombine.high %v1618_v43, %v1634_v51  ;;  %v1691_v21 = vcombine.high %v1625_v41, %v1641_v5 }
 0x345   : > { %v1698_v11 = vrot.slane %v1690_v58, %v2590_v28  ;;  %v1682_v13 = vrot.slane %v1674_v57, %v2590_v28  ;;  %v1705_v24 = vrot.slane %v1691_v21, %v2590_v28 }
 0x347   : > { %v2172_v6 = vpop.eup %2171 }
 0x35d   : > { %v1504_v17 = vpop.f32.mrf.mxu1 }
 0x35e   : > { %v1607_v46 = vmul.f32 %v2166_v37, %v1504_v17 }
 0x35f   : > { %v2064_v20 = vpop.f32.mrf.mxu1 }
 0x361   : > { %v1507_v22 = vpop.f32.mrf.mxu1 }
 0x362   : > { %v1689_v22 = vrot.slane %v1675_v10, %v2590_v28 }
 0x363   : > { %v2065_v23 = vpop.f32.mrf.mxu1 }
 0x369   : > { %v1458_v29 = vpop.f32.mrf.mxu0 }
 0x36a   : > { %v1606_v52 = vmul.f32 %v2168_v38, %v1458_v29 }
 0x36b   : > { %v2058_v34 = vpop.f32.mrf.mxu0 }
 0x36d   : > { %v1461_v32 = vpop.f32.mrf.mxu0 }
 0x36f   : > { %v2059_v39 = vpop.f32.mrf.mxu0 }
 0x371   : > { %v1550_v42 = vpop.f32.mrf.mxu0  ;;  %v1596_v45 = vpop.f32.mrf.mxu1 }
 0x372   : > { %v1608_v47 = vmul.f32 %v2170_v40, %v1550_v42  ;;  %v1609_v48 = vmul.f32 %v2172_v6, %v1596_v45 }
 0x373   : > { %v2070_v49 = vpop.f32.mrf.mxu0  ;;  %v2076_v50 = vpop.f32.mrf.mxu1 }
 0x374   : > { %v1642_v53 = vcombine.low %v1606_v52, %v1608_v47  ;;  %v1643_v54 = vcombine.high %v1606_v52, %v1608_v47  ;;  %v1658_v55 = vcombine.low %v1607_v46, %v1609_v48  ;;  %v1659_v56 = vcombine.high %v1607_v46, %v1609_v48 }
 0x375   : > { %v1553_v59 = vpop.f32.mrf.mxu0  ;;  %v1599_v60 = vpop.f32.mrf.mxu1 }
 0x376   : > { %v1650_v3 = vrot.slane %v1642_v53, %v2583_v19  ;;  %v1657_v61 = vrot.slane %v1643_v54, %v2583_v19  ;;  %v1666_v62 = vrot.slane %v1658_v55, %v2583_v19  ;;  %v1673_v63 = vrot.slane %v1659_v56, %v2583_v19 }
 0x377   : > { %v2071_v0 = vpop.f32.mrf.mxu0  ;;  %v2077_v1 = vpop.f32.mrf.mxu1 }
 0x378   : > { %v1706_v7 = vcombine.low %v1650_v3, %v1666_v62  ;;  %v1707_v8 = vcombine.high %v1650_v3, %v1666_v62  ;;  %v1722_v9 = vcombine.low %v1657_v61, %v1673_v63  ;;  %v1723_v15 = vcombine.high %v1657_v61, %v1673_v63 }
 0x37a   : > { %v1730_v12 = vrot.slane %v1722_v9, %v2590_v28  ;;  %v1714_v14 = vrot.slane %v1706_v7, %v2590_v28  ;;  %v1721_v18 = vrot.slane %v1707_v8, %v2590_v28  ;;  %v1737_v4 = vrot.slane %v1723_v15, %v2590_v28 }
 0x37c   : > { %v1743_v16 = vcombine.high %v1698_v11, %v1730_v12  ;;  %v1739_v17 = vcombine.high %v1682_v13, %v1714_v14  ;;  %v1742_v19 = vcombine.low %v1698_v11, %v1730_v12  ;;  %v1738_v20 = vcombine.low %v1682_v13, %v1714_v14 }
 0x37d   : > { %v1741_v23 = vcombine.high %v1689_v22, %v1721_v18  ;;  %v1740_v25 = vcombine.low %v1689_v22, %v1721_v18  ;;  %v1744_v26 = vcombine.low %v1705_v24, %v1737_v4  ;;  %v1745_v27 = vcombine.high %v1705_v24, %v1737_v4 }
 0x37e   : > { %1759 = vrot.lane.b32.xlu0 %v1743_v16, %s2330_s7  ;;  %1747 = vrot.lane.b32.xlu1 %v1739_v17, %s2330_s7 }
 0x382   : > { %1755 = vrot.lane.b32.xlu0 %v1741_v23, %s2331_s4  ;;  %1751 = vrot.lane.b32.xlu1 %v1740_v25, %s2332_s6 }
 0x386   : > { %1763 = vrot.lane.b32.xlu1 %v1744_v26, %s2332_s6 }
 0x38a   : > { %1767 = vrot.lane.b32.xlu1 %v1745_v27, %s2331_s4 }
 0x3f0   : > { %v1760_v29 = vpop.permute.xlu0 %1759  ;;  %v1748_v30 = vpop.permute.xlu1 %1747 }
 0x3f1   : > { %v1770_v31 = vsel %vm759_vm1, %v1738_v20, %v1748_v30  ;;  %v1775_v44 = vsel %vm759_vm1, %v1742_v19, %v1760_v29 }
 0x3f4   : > { %v1756_v33 = vpop.permute.xlu0 %1755  ;;  %v1752_v34 = vpop.permute.xlu1 %1751 }
 0x3f5   : > { %v1772_v35 = vsel %vm1771_vm4, %v1770_v31, %v1752_v34 }
 0x3f6   : > { %v1774_v2 = vsel %vm1773_vm5, %v1772_v35, %v1756_v33 }
 0x3f7   : > { %1778 = vst [vmem:[%s259_s9] sm:$0xff] %v1774_v2 }
 0x3f8   : > { %v1764_v28 = vpop.permute.xlu1 %1763 }
 0x3f9   : > { %v1776_v36 = vsel %vm1771_vm4, %v1775_v44, %v1764_v28 }
 0x3fc   : > { %v1768_v32 = vpop.permute.xlu1 %1767 }
 0x3fd   : > { %v1777_v37 = vsel %vm1773_vm5, %v1776_v36, %v1768_v32 }
 0x3fe   : > { %1779 = vst [vmem:[%s259_s9 + $0x8] sm:$0xff] %v1777_v37 }
 0x3ff   : > { %2270 = shalt.err (!%p2267_p3)
}
 0x400   : > { %s2271_s10 = scalar_lea.hbm %s2814_s30, 256  ;;  %s2275_s5 = scalar_lea.hbm %s2854_s3, 2048 }
 0x401   : > { %p2272_p10 = scmp.ne.s32.totalorder %s2814_s30, %s2271_s10  ;;  %p2276_p5 = scmp.lt.s32.totalorder %s2814_s30, %s2854_s3 }
 0x402   : > { %p2277_p7 = scmp.lt.s32.totalorder %s2275_s5, %s2271_s10 }
 0x403   : > { %p2273_p11 = pnand %p2272_p10, %p2873_p6 }
 0x404   : > { %p2278_p1 = por %p2277_p7, %p2276_p5 }
 0x405   : > { %p2274_p4 = pneg %p2273_p11 }
 0x407   : > { %p2279_p12 = pnand %p2278_p1, %p2274_p4 }
 0x409   : > { %2282 = shalt.err (!%p2279_p12)
}
 0x40a   : > { %2084 = dma.vmem_to_hbm [thread:$0]  (%p2873_p6), %s1796_s1, 256, %s2814_s30, %s1781_s26  }
 0x40b PF: > { %p2101_p8 = scmp.ge.s32.totalorder %s2325_s15, 2  ;;  %s1807_s25 = sand.u32 1, %s2313_s12  }
 0x40c   : > { %p2874_p9 = scmp.ne.s32.totalorder %s2863_s24, 0  ;;  %s1808_s7 = scalar_lea.sflag [#allocation4], %s1807_s25 }
 0x40e   : > { %p2097_p0 = pnand %p2101_p8, %p2874_p9 }
 0x410   : > { %p2098_p2 = pneg %p2097_p0 }
 0x412   : > { %2308 = dma.done.wait (%p2098_p2), %s1808_s7, 256  }
 0x413   : > { %2310 = vsyncadd (%p2098_p2), %s1808_s7, 4294967040  ;;  %s2875_s4 = sld [smem:[#allocation12_spill]]  ;;  %p19_p13 = scmp.ge.s32.totalorder %s2383_s18, 10  }
 0x414   : > { %s2876_s12 = smov %s2317_s13  ;;  %s2877_s13 = smov %s2321_s14 }
 0x415   : > { %s2879_s15 = smov %s2383_s18  ;;  %21 = sbr.rel (!%p19_p13) target bundleno = 10 (0xa), region = 101 }
 0x419   : > { %s2878_s14 = smov %s2875_s4 }
 0x41a   :  { %1813 = vsyncpa [#allocation3], 1 }
 0x41b   :  { %1815 = vsyncpa [#allocation3 + $0x1], 1 }
 0x41c   :  { %1816 = vsyncpa [#allocation6], 1 }
 0x41d   :  { %1818 = vsyncpa [#allocation6 + $0x1], 1 }
 0x41e   :  { %1819 = vsyncpa [#allocation4], 1 }
 0x41f   :  { %1821 = vsyncpa [#allocation4 + $0x1], 1 }

</bundles_post_ra>
